<compile_context>
chip_gen: v6e
topology: v6e:2x2x1
jax: 0.10.0
libtpu: 0.0.40
codegen_flags: <defaults>
</compile_context>

<pallas_src>
import jax
import jax.numpy as jnp
from jax.experimental import pallas as pl
from jax.experimental.pallas import tpu as pltpu

LANE = 128
_RELU_LAYERS = (0, 1, 3, 4)  # layer3 (idx 2) ends in Dropout (identity, eval); idx 5 is plain Linear


def _round_up(v, m):
    return ((v + m - 1) // m) * m


def _cdiv(a, b):
    return (a + b - 1) // b


def _choose_batch_tile(b8, tb_max=1024, min_split=256):
    """Pick (tile, n_tiles) for a batch already rounded up to a multiple of 8.

    - Tile as large as possible (up to tb_max) for MXU M-fill and grid-step
      amortization.
    - For b8 >= 2*min_split, force an even number of grid steps so v7x's two
      TensorCores both get work under dimension_semantics=("parallel",).
    - Tile derived from ceil(b8/n) so the last tile is not mostly padding.
    """
    if b8 >= 2 * min_split:
        n = 2 * _cdiv(b8, 2 * tb_max)          # even step count, tiles <= tb_max
    else:
        n = _cdiv(b8, tb_max)                  # tiny batch: one tile
    tb = _round_up(_cdiv(b8, n), 8)
    return tb, n


def make_batch_net_kernel(row_offsets, k_sizes):
    """Build the fused MLP kernel over one batch tile.

    x_ref: (TB, in_dim) f32       activation tile
    w_ref: (sum(k_sizes), 128) bf16  packed, BN-folded, zero-padded weights
    b_ref: (8, 128) f32           packed, BN-folded, zero-padded biases (rows 0..5)
    o_ref: (TB, 128) f32          lane-dense output (cols >= out_dim are zero)
    """
    def kernel(x_ref, w_ref, b_ref, o_ref):
        biases = b_ref[...]                       # one (8,128) f32 vreg, loaded once
        h = x_ref[...].astype(jnp.float32)
        for li, (r0, k) in enumerate(zip(row_offsets, k_sizes)):
            w = w_ref[r0:r0 + k, :]               # static bf16 slice of the slab
            # bf16 x bf16 MXU matmul, f32 accumulation.
            h = jnp.dot(h.astype(jnp.bfloat16), w,
                        preferred_element_type=jnp.float32)
            h = h + biases[li:li + 1, :]          # f32 VPU epilogue
            if li in _RELU_LAYERS:
                h = jnp.maximum(h, 0.0)
        o_ref[...] = h.astype(o_ref.dtype)
    return kernel


def fold_and_pack_params(params, dims, eps=1e-5):
    """Fold eval-mode BatchNorm into each Linear and pack into two slabs.

    Returns a bf16 weight slab (sum_k, 128), an f32 bias slab (8, 128),
    per-layer row offsets and K sizes.
    """
    names = ("1", "2", "3", "4", "5", "o")
    w_blocks, b_rows, row_offsets, k_sizes = [], [], [], []
    row = 0
    for i, name in enumerate(names):
        fan_in, fan_out = dims[i], dims[i + 1]
        assert fan_out <= LANE, f"layer {name}: fan_out {fan_out} > {LANE}"
        w = params[f"w{name}"]                    # (fan_in, fan_out)
        b = params[f"b{name}"]                    # (fan_out,)
        if name != "o":
            scale = params[f"g{name}"] / jnp.sqrt(params[f"v{name}"] + eps)
            w = w * scale[None, :]
            b = b * scale + (params[f"be{name}"] - params[f"m{name}"] * scale)
        k_pad = fan_in if i == 0 else LANE        # layers >= 2 consume 128-padded activations
        assert fan_in <= k_pad, f"layer {name}: fan_in {fan_in} > padded K {k_pad}"
        w_pad = jnp.zeros((k_pad, LANE), jnp.float32).at[:fan_in, :fan_out].set(w)
        b_pad = jnp.zeros((LANE,), jnp.float32).at[:fan_out].set(b)
        w_blocks.append(w_pad)
        b_rows.append(b_pad)
        row_offsets.append(row)
        k_sizes.append(k_pad)
        row += k_pad
    while len(b_rows) < 8:                        # pad bias slab to 8 sublanes
        b_rows.append(jnp.zeros((LANE,), jnp.float32))
    w_slab = jnp.concatenate(w_blocks, axis=0).astype(jnp.bfloat16)  # (672,128) bf16
    b_slab = jnp.stack(b_rows, axis=0)                               # (8,128) f32
    return w_slab, b_slab, tuple(row_offsets), tuple(k_sizes)


def batch_net_forward(x, w_slab, b_slab, row_offsets, k_sizes, out_dim):
    B, in_dim = x.shape
    assert in_dim % 8 == 0, "in_dim must be a multiple of 8"
    assert in_dim == k_sizes[0]

    b8 = _round_up(B, 8)
    tb, n_tiles = _choose_batch_tile(b8)
    b_pad = tb * n_tiles
    if b_pad != B:
        x = jnp.pad(x, ((0, b_pad - B), (0, 0)))

    kernel = make_batch_net_kernel(row_offsets, k_sizes)
    out = pl.pallas_call(
        kernel,
        out_shape=jax.ShapeDtypeStruct((b_pad, LANE), jnp.float32),
        grid_spec=pltpu.PrefetchScalarGridSpec(
            num_scalar_prefetch=0,
            grid=(n_tiles,),
            in_specs=[
                pl.BlockSpec((tb, in_dim), lambda i: (i, 0)),
                # Constant index_map -> weight/bias slabs stay VMEM-resident
                # across batch grid steps (no re-DMA).
                pl.BlockSpec(w_slab.shape, lambda i: (0, 0)),
                pl.BlockSpec(b_slab.shape, lambda i: (0, 0)),
            ],
            out_specs=pl.BlockSpec((tb, LANE), lambda i: (i, 0)),
        ),
        compiler_params=pltpu.CompilerParams(
            dimension_semantics=("parallel",)),   # shards batch tiles across v7x's 2 TCs
    )(x, w_slab, b_slab)
    return out[:B, :out_dim]


def make_params(key, dims):
    """Deterministic synthetic PyTorch-style parameters.

    dims = (in_dim, h1, h2, h3, h4, h5, out_dim).
    Linear weights stored as (in, out) = transpose of PyTorch's (out, in).
    BatchNorm: gamma/beta/running_mean/running_var per hidden layer.
    """
    names = ("1", "2", "3", "4", "5", "o")
    params = {}
    for i, name in enumerate(names):
        fan_in, fan_out = dims[i], dims[i + 1]
        key, kw, kb, km, kv, kg, kbe = jax.random.split(key, 7)
        bound = 1.0 / (fan_in ** 0.5)
        params[f"w{name}"] = jax.random.uniform(
            kw, (fan_in, fan_out), jnp.float32, -bound, bound)
        params[f"b{name}"] = jax.random.uniform(
            kb, (fan_out,), jnp.float32, -bound, bound)
        if name != "o":
            params[f"g{name}"] = jax.random.uniform(kg, (fan_out,), jnp.float32, 0.5, 1.5)
            params[f"be{name}"] = jax.random.uniform(kbe, (fan_out,), jnp.float32, -0.5, 0.5)
            params[f"m{name}"] = jax.random.normal(km, (fan_out,), jnp.float32) * 0.1
            params[f"v{name}"] = jax.random.uniform(kv, (fan_out,), jnp.float32, 0.5, 1.5)
    return params


def reference_forward(x, p, eps=1e-5):
    """Pure-JAX eval-mode reference with UNfolded BatchNorm (module semantics)."""
    def bn(h, name):
        scale = p[f"g{name}"] / jnp.sqrt(p[f"v{name}"] + eps)
        return (h - p[f"m{name}"]) * scale + p[f"be{name}"]

    h = x.astype(jnp.float32)
    h = jnp.maximum(bn(h @ p["w1"] + p["b1"], "1"), 0.0)
    h = jnp.maximum(bn(h @ p["w2"] + p["b2"], "2"), 0.0)
    h = bn(h @ p["w3"] + p["b3"], "3")            # Dropout = identity (eval)
    h = jnp.maximum(bn(h @ p["w4"] + p["b4"], "4"), 0.0)
    h = jnp.maximum(bn(h @ p["w5"] + p["b5"], "5"), 0.0)
    return h @ p["wo"] + p["bo"]


if __name__ == "__main__":
    # Small shapes consistent with the MLP: batch=8, in_dim=32,
    # hiddens (64, 64, 32, 32, 16), out_dim=8.
    dims = (32, 64, 64, 32, 32, 16, 8)
    B = 8

    key = jax.random.PRNGKey(0)
    kx, kp = jax.random.split(key)
    x = jax.random.normal(kx, (B, dims[0]), jnp.float32)
    params = make_params(kp, dims)

    # One-time offline BN fold + parameter packing (pure wrapper-side prep).
    w_slab, b_slab, row_offsets, k_sizes = fold_and_pack_params(params, dims)

    out = batch_net_forward(x, w_slab, b_slab, row_offsets, k_sizes, dims[-1])
    out = jax.block_until_ready(out)

    ref = reference_forward(x, params)
    assert out.shape == (B, dims[-1])
    # bf16 MXU inputs: loosen tolerance vs the all-f32 reference.
    assert jnp.allclose(out, ref, atol=5e-2, rtol=5e-2), "mismatch vs JAX reference"

    print("KERNEL_OK")
</pallas_src>

<mosaic_0001>
module attributes {stable_mosaic.version = 11 : i64} {
  func.func @kernel(%arg0: i32, %arg1: memref<8x32xf32, #tpu.memory_space<vmem>>, %arg2: memref<672x128xbf16, #tpu.memory_space<vmem>>, %arg3: memref<8x128xf32, #tpu.memory_space<vmem>>, %arg4: memref<8x128xf32, #tpu.memory_space<vmem>>) attributes {dimension_semantics = [#tpu.dimension_semantics<parallel>], iteration_bounds = array<i64: 1>, scalar_prefetch = 0 : i64, scratch_operands = 0 : i64, tpu.core_type = #tpu.core_type<tc>, window_params = [{transform_indices = @transform_0, window_bounds = array<i64: 8, 32>}, {pipeline_mode = #tpu.pipeline_mode<synchronous>, transform_indices = @transform_1, window_bounds = array<i64: 672, 128>}, {pipeline_mode = #tpu.pipeline_mode<synchronous>, transform_indices = @transform_2, window_bounds = array<i64: 8, 128>}, {transform_indices = @transform_3, window_bounds = array<i64: 8, 128>}]} {
    %c0 = arith.constant 0 : index
    %c0_0 = arith.constant 0 : index
    %0 = vector.load %arg3[%c0, %c0_0] : memref<8x128xf32, #tpu.memory_space<vmem>>, vector<8x128xf32>
    %c0_1 = arith.constant 0 : index
    %c0_2 = arith.constant 0 : index
    %1 = vector.load %arg1[%c0_1, %c0_2] : memref<8x32xf32, #tpu.memory_space<vmem>>, vector<8x32xf32>
    %c0_3 = arith.constant 0 : index
    %c0_4 = arith.constant 0 : index
    %2 = vector.load %arg2[%c0_3, %c0_4] : memref<672x128xbf16, #tpu.memory_space<vmem>>, vector<32x128xbf16>
    %3 = arith.truncf %1 : vector<8x32xf32> to vector<8x32xbf16>
    %cst = arith.constant dense<0.000000e+00> : vector<8x128xf32>
    %4 = tpu.matmul %3, %2, %cst {dimension_numbers = #tpu.dot_dimension_numbers<[1], [0], [0], [1], [0, 0, 1, 1], [], []>} : vector<8x32xbf16>, vector<32x128xbf16>, vector<8x128xf32> -> vector<8x128xf32>
    %5 = vector.extract_strided_slice %0 {offsets = [0, 0], sizes = [1, 128], strides = [1, 1]} : vector<8x128xf32> to vector<1x128xf32>
    %6 = vector.broadcast %5 : vector<1x128xf32> to vector<8x128xf32>
    %7 = arith.addf %4, %6 : vector<8x128xf32>
    %cst_5 = arith.constant 0.000000e+00 : f32
    %8 = vector.broadcast %cst_5 : f32 to vector<8x128xf32>
    %9 = arith.maximumf %7, %8 : vector<8x128xf32>
    %c32 = arith.constant 32 : index
    %c0_6 = arith.constant 0 : index
    %10 = vector.load %arg2[%c32, %c0_6] : memref<672x128xbf16, #tpu.memory_space<vmem>>, vector<128x128xbf16>
    %11 = arith.truncf %9 : vector<8x128xf32> to vector<8x128xbf16>
    %cst_7 = arith.constant dense<0.000000e+00> : vector<8x128xf32>
    %12 = tpu.matmul %11, %10, %cst_7 {dimension_numbers = #tpu.dot_dimension_numbers<[1], [0], [0], [1], [0, 0, 1, 1], [], []>} : vector<8x128xbf16>, vector<128x128xbf16>, vector<8x128xf32> -> vector<8x128xf32>
    %13 = vector.extract_strided_slice %0 {offsets = [1, 0], sizes = [1, 128], strides = [1, 1]} : vector<8x128xf32> to vector<1x128xf32>
    %14 = vector.broadcast %13 : vector<1x128xf32> to vector<8x128xf32>
    %15 = arith.addf %12, %14 : vector<8x128xf32>
    %cst_8 = arith.constant 0.000000e+00 : f32
    %16 = vector.broadcast %cst_8 : f32 to vector<8x128xf32>
    %17 = arith.maximumf %15, %16 : vector<8x128xf32>
    %c160 = arith.constant 160 : index
    %c0_9 = arith.constant 0 : index
    %18 = vector.load %arg2[%c160, %c0_9] : memref<672x128xbf16, #tpu.memory_space<vmem>>, vector<128x128xbf16>
    %19 = arith.truncf %17 : vector<8x128xf32> to vector<8x128xbf16>
    %cst_10 = arith.constant dense<0.000000e+00> : vector<8x128xf32>
    %20 = tpu.matmul %19, %18, %cst_10 {dimension_numbers = #tpu.dot_dimension_numbers<[1], [0], [0], [1], [0, 0, 1, 1], [], []>} : vector<8x128xbf16>, vector<128x128xbf16>, vector<8x128xf32> -> vector<8x128xf32>
    %21 = vector.extract_strided_slice %0 {offsets = [2, 0], sizes = [1, 128], strides = [1, 1]} : vector<8x128xf32> to vector<1x128xf32>
    %22 = vector.broadcast %21 : vector<1x128xf32> to vector<8x128xf32>
    %23 = arith.addf %20, %22 : vector<8x128xf32>
    %c288 = arith.constant 288 : index
    %c0_11 = arith.constant 0 : index
    %24 = vector.load %arg2[%c288, %c0_11] : memref<672x128xbf16, #tpu.memory_space<vmem>>, vector<128x128xbf16>
    %25 = arith.truncf %23 : vector<8x128xf32> to vector<8x128xbf16>
    %cst_12 = arith.constant dense<0.000000e+00> : vector<8x128xf32>
    %26 = tpu.matmul %25, %24, %cst_12 {dimension_numbers = #tpu.dot_dimension_numbers<[1], [0], [0], [1], [0, 0, 1, 1], [], []>} : vector<8x128xbf16>, vector<128x128xbf16>, vector<8x128xf32> -> vector<8x128xf32>
    %27 = vector.extract_strided_slice %0 {offsets = [3, 0], sizes = [1, 128], strides = [1, 1]} : vector<8x128xf32> to vector<1x128xf32>
    %28 = vector.broadcast %27 : vector<1x128xf32> to vector<8x128xf32>
    %29 = arith.addf %26, %28 : vector<8x128xf32>
    %cst_13 = arith.constant 0.000000e+00 : f32
    %30 = vector.broadcast %cst_13 : f32 to vector<8x128xf32>
    %31 = arith.maximumf %29, %30 : vector<8x128xf32>
    %c416 = arith.constant 416 : index
    %c0_14 = arith.constant 0 : index
    %32 = vector.load %arg2[%c416, %c0_14] : memref<672x128xbf16, #tpu.memory_space<vmem>>, vector<128x128xbf16>
    %33 = arith.truncf %31 : vector<8x128xf32> to vector<8x128xbf16>
    %cst_15 = arith.constant dense<0.000000e+00> : vector<8x128xf32>
    %34 = tpu.matmul %33, %32, %cst_15 {dimension_numbers = #tpu.dot_dimension_numbers<[1], [0], [0], [1], [0, 0, 1, 1], [], []>} : vector<8x128xbf16>, vector<128x128xbf16>, vector<8x128xf32> -> vector<8x128xf32>
    %35 = vector.extract_strided_slice %0 {offsets = [4, 0], sizes = [1, 128], strides = [1, 1]} : vector<8x128xf32> to vector<1x128xf32>
    %36 = vector.broadcast %35 : vector<1x128xf32> to vector<8x128xf32>
    %37 = arith.addf %34, %36 : vector<8x128xf32>
    %cst_16 = arith.constant 0.000000e+00 : f32
    %38 = vector.broadcast %cst_16 : f32 to vector<8x128xf32>
    %39 = arith.maximumf %37, %38 : vector<8x128xf32>
    %c544 = arith.constant 544 : index
    %c0_17 = arith.constant 0 : index
    %40 = vector.load %arg2[%c544, %c0_17] : memref<672x128xbf16, #tpu.memory_space<vmem>>, vector<128x128xbf16>
    %41 = arith.truncf %39 : vector<8x128xf32> to vector<8x128xbf16>
    %cst_18 = arith.constant dense<0.000000e+00> : vector<8x128xf32>
    %42 = tpu.matmul %41, %40, %cst_18 {dimension_numbers = #tpu.dot_dimension_numbers<[1], [0], [0], [1], [0, 0, 1, 1], [], []>} : vector<8x128xbf16>, vector<128x128xbf16>, vector<8x128xf32> -> vector<8x128xf32>
    %43 = vector.extract_strided_slice %0 {offsets = [5, 0], sizes = [1, 128], strides = [1, 1]} : vector<8x128xf32> to vector<1x128xf32>
    %44 = vector.broadcast %43 : vector<1x128xf32> to vector<8x128xf32>
    %45 = arith.addf %42, %44 : vector<8x128xf32>
    %c0_19 = arith.constant 0 : index
    %c0_20 = arith.constant 0 : index
    %46 = vector.load %arg4[%c0_19, %c0_20] : memref<8x128xf32, #tpu.memory_space<vmem>>, vector<8x128xf32>
    tpu.vector_store %arg4[%c0_19, %c0_20], %45 {strides = array<i32>} : memref<8x128xf32, #tpu.memory_space<vmem>>, vector<8x128xf32>,
    return
  }
  func.func @transform_0(%arg0: i32) -> (i32, i32) {
    %c0_i32 = arith.constant 0 : i32
    %c0_i32_0 = arith.constant 0 : i32
    return %arg0, %c0_i32 : i32, i32
  }
  func.func @transform_1(%arg0: i32) -> (i32, i32) {
    %c0_i32 = arith.constant 0 : i32
    %c0_i32_0 = arith.constant 0 : i32
    %c0_i32_1 = arith.constant 0 : i32
    return %c0_i32, %c0_i32_0 : i32, i32
  }
  func.func @transform_2(%arg0: i32) -> (i32, i32) {
    %c0_i32 = arith.constant 0 : i32
    %c0_i32_0 = arith.constant 0 : i32
    %c0_i32_1 = arith.constant 0 : i32
    return %c0_i32, %c0_i32_0 : i32, i32
  }
  func.func @transform_3(%arg0: i32) -> (i32, i32) {
    %c0_i32 = arith.constant 0 : i32
    %c0_i32_0 = arith.constant 0 : i32
    return %arg0, %c0_i32 : i32, i32
  }
}

</mosaic_0001>

<bundles_post_ra>
// kernel: tpu_custom_call.1
= control target key start
LH: loop header
LB: loop body
LE: loop exit
PB: predicated region body
PF: predicated region fallthrough
CT: control target
= control target key end

     0   :  { %8 = vsyncpa [#allocation3], 0  ;;  %s1131_s0 = inlined_call_operand.hbm [shape: f32[8,32], index: 0, kind: input, shape index: {}]   ;;  %s1132_s1 = inlined_call_operand.hbm [shape: bf16[672,128], index: 1, kind: input, shape index: {}]   ;;  %s1133_s2 = inlined_call_operand.hbm [shape: f32[8,128], index: 2, kind: input, shape index: {}]   ;;  %s1134_s3 = inlined_call_operand.hbm [shape: f32[8,128], index: 3, kind: output, shape index: {}]  }
   0x1   :  { %9 = vsyncpa [#allocation6], 0 }
   0x2   :  { %10 = vsyncpa [#allocation4], 0  ;;  %s1021_s12 = smov [#allocation5]  }
   0x3   :  { %s26_s13 = sshll.u32 %s1021_s12, 4  ;;  %s27_s13 = int_to_ptr.vmem [resolvable:$true] %s26_s13 }
   0x4   :  { %s943_s14 = scalar_lea.vmem %s27_s13, 5376  ;;  %p948_p1 = scmp.lt.s32.totalorder %s27_s13, %s27_s13 }
   0x5   :  { %p944_p0 = scmp.ne.s32.totalorder %s27_s13, %s943_s14  ;;  %p949_p2 = scmp.lt.s32.totalorder %s943_s14, %s943_s14 }
   0x7   :  { %p950_p3 = por %p949_p2, %p948_p1 }
   0x9   :  { %p951_p4 = pnand %p950_p3, %p944_p0 }
   0xb   :  { %954 = shalt.err (!%p951_p4)
}
   0xc   :  { %s1022_s15 = smov 64   ;;  %s1023_s16 = smov 4  }
   0xd   :  { %32 = dma.hbm_to_vmem [thread:$0]  %s1132_s1, 5376, %s27_s13, [#allocation6], %s1022_s15, %s1022_s15, %s1023_s16  }
   0xe   :  { %s1024_s19 = smov [#allocation2]   ;;  %s1025_s21 = smov [#allocation7]  }
   0xf   :  { %s17_s20 = sshll.u32 %s1024_s19, 4  ;;  %s39_s22 = sshll.u32 %s1025_s21, 4  ;;  %s18_s20 = int_to_ptr.vmem [resolvable:$true] %s17_s20  ;;  %s40_s22 = int_to_ptr.vmem [resolvable:$true] %s39_s22 }
  0x10   :  { %s963_s23 = scalar_lea.vmem %s18_s20, 128  ;;  %p968_p6 = scmp.lt.s32.totalorder %s18_s20, %s18_s20 }
  0x11   :  { %p964_p5 = scmp.ne.s32.totalorder %s18_s20, %s963_s23  ;;  %p969_p7 = scmp.lt.s32.totalorder %s963_s23, %s963_s23 }
  0x13   :  { %p970_p8 = por %p969_p7, %p968_p6 }
  0x15   :  { %p971_p9 = pnand %p970_p8, %p964_p5 }
  0x17   :  { %974 = shalt.err (!%p971_p9)
}
  0x18   :  { %20 = dma.hbm_to_vmem [thread:$0]  %s1131_s0, 128, %s18_s20, [#allocation3]  }
  0x19   :  { %s983_s26 = scalar_lea.vmem %s40_s22, 128  ;;  %p988_p11 = scmp.lt.s32.totalorder %s40_s22, %s40_s22 }
  0x1a   :  { %p984_p10 = scmp.ne.s32.totalorder %s40_s22, %s983_s26  ;;  %p989_p12 = scmp.lt.s32.totalorder %s983_s26, %s983_s26 }
  0x1c   :  { %p990_p13 = por %p989_p12, %p988_p11 }
  0x1e   :  { %p991_p0 = pnand %p990_p13, %p984_p10 }
  0x20   :  { %994 = shalt.err (!%p991_p0)
}
  0x21   :  { %42 = dma.hbm_to_vmem [thread:$0]  %s1133_s2, 128, %s40_s22, [#allocation6]  }
  0x22   :  { %1015 = dma.done.wait [#allocation3], 128  }
  0x23   :  { %1016 = vsyncadd [#allocation3], 4294967168 }
  0x24   :  { %1017 = dma.done.wait [#allocation6], 5504  }
  0x25   :  { %1018 = vsyncadd [#allocation6], 4294961792  ;;  %v1026_v0 = vmov 0.0   ;;  %vm1027_vm0 = vmmov 0   ;;  %v893_v1 = vld [vmem:[#allocation5 + $0x8] sm:$0xff]   ;;  %v894_v2 = vld [vmem:[#allocation5] sm:$0xff]   ;;  %v60_v19 = vlaneseq }
  0x26   :  { %777 = vmatprep.subr.bf16.mxu0 %v1026_v0  ;;  %781 = vmatprep.mubr.msk.bf16.mxu0 %vm1027_vm0, %v1026_v0  ;;  %v54_v3 = vld [vmem:[#allocation2] sm:$0xff]  ;;  %v895_v4 = vld [vmem:[#allocation5 + $0x48] sm:$0xff]   ;;  %v896_v6 = vld [vmem:[#allocation5 + $0x40] sm:$0xff]   ;;  %vm76_vm1 = vcmask 261120   ;;  %s1028_s0 = smov [#allocation8]  }
  0x27   :  { %785 = vmatprep.subr.bf16.mxu1 %v1026_v0  ;;  %801 = vmatprep.mubr.msk.bf16.mxu1 %vm1027_vm0, %v1026_v0  ;;  %v59_v5 = vpack.c.bf16 %v54_v3, %v54_v3  ;;  %v897_v7 = vld [vmem:[#allocation5 + $0x38] sm:$0xff]   ;;  %v898_v8 = vld [vmem:[#allocation5 + $0x30] sm:$0xff]   ;;  %v899_v9 = vld [vmem:[#allocation5 + $0x28] sm:$0xff]   ;;  %v1082_v20 = vshrl.u32 %v60_v19, 7  ;;  %s676_s2 = sshll.u32 %s1028_s0, 4  ;;  %s677_s2 = int_to_ptr.vmem [resolvable:$true] %s676_s2 }
  0x28   :  { %778 = vmatpush3.bf16.msra.mxu0 %v893_v1  ;;  %786 = vmatpush3.bf16.msra.mxu1 %v895_v4  ;;  %v900_v10 = vld [vmem:[#allocation5 + $0x20] sm:$0xff]   ;;  %v901_v11 = vld [vmem:[#allocation5 + $0x18] sm:$0xff]   ;;  %v902_v12 = vld [vmem:[#allocation5 + $0x10] sm:$0xff]   ;;  %s995_s28 = scalar_lea.vmem %s677_s2, 128  ;;  %p1000_p2 = scmp.lt.s32.totalorder %s677_s2, %s677_s2 }
  0x29   :  { %779 = vmatprep.subr.bf16.mxu0 %v1026_v0  ;;  %787 = vmatprep.subr.bf16.mxu1 %v1026_v0  ;;  %v903_v13 = vld [vmem:[#allocation5 + $0x88] sm:$0xff]   ;;  %v904_v14 = vld [vmem:[#allocation5 + $0x80] sm:$0xff]   ;;  %v905_v15 = vld [vmem:[#allocation5 + $0x78] sm:$0xff]   ;;  %v62_v21 = vsub.s32 0, %v1082_v20  ;;  %v140_v40 = vsub.s32 1, %v1082_v20  ;;  %v250_v56 = vsub.s32 2, %v1082_v20  ;;  %p996_p1 = scmp.ne.s32.totalorder %s677_s2, %s995_s28  ;;  %p1001_p3 = scmp.lt.s32.totalorder %s995_s28, %s995_s28 }
  0x2a   :  { %v906_v16 = vld [vmem:[#allocation5 + $0x70] sm:$0xff]   ;;  %v907_v17 = vld [vmem:[#allocation5 + $0x68] sm:$0xff]   ;;  %v908_v18 = vld [vmem:[#allocation5 + $0x60] sm:$0xff]  }
  0x2b   :  { %v1085_v22 = vld [vmem:[#allocation7] sm:$0xff]  ;;  %v909_v31 = vld [vmem:[#allocation5 + $0x58] sm:$0xff]   ;;  %v911_v33 = vld [vmem:[#allocation5 + $0xc8] sm:$0xff]   ;;  %p1002_p4 = por %p1001_p3, %p1000_p2 }
  0x2c   :  { %780 = vmatpush3.bf16.msra.mxu0 %v894_v2  ;;  %788 = vmatpush3.bf16.msra.mxu1 %v896_v6  ;;  %v63_v23 = vrot.slane %v1085_v22, %v62_v21  ;;  %v910_v32 = vld [vmem:[#allocation5 + $0x50] sm:$0xff]   ;;  %v912_v34 = vld [vmem:[#allocation5 + $0xc0] sm:$0xff]   ;;  %v913_v35 = vld [vmem:[#allocation5 + $0xb8] sm:$0xff]   ;;  %v141_v41 = vrot.slane %v1085_v22, %v140_v40  ;;  %v251_v57 = vrot.slane %v1085_v22, %v250_v56  ;;  %v469_v21 = vsub.s32 4, %v1082_v20 }
  0x2d   :  { %805 = vmatprep.subr.bf16.mxu0 %v1026_v0  ;;  %789 = vmatprep.subr.bf16.mxu1 %v1026_v0  ;;  %v914_v36 = vld [vmem:[#allocation5 + $0xb0] sm:$0xff]   ;;  %v915_v37 = vld [vmem:[#allocation5 + $0xa8] sm:$0xff]   ;;  %v916_v38 = vld [vmem:[#allocation5 + $0xa0] sm:$0xff]   ;;  %p1003_p5 = pnand %p1002_p4, %p996_p1 }
  0x2e   :  { %v917_v39 = vld [vmem:[#allocation5 + $0x98] sm:$0xff]   ;;  %v918_v49 = vld [vmem:[#allocation5 + $0x90] sm:$0xff]   ;;  %v919_v50 = vld [vmem:[#allocation5 + $0x108] sm:$0xff]  }
  0x2f   :  { %782 = vmatmul.mubr.msk.bf16.vlgmr.msra.gmra.mxu0 %vm76_vm1, %v59_v5  ;;  %v920_v51 = vld [vmem:[#allocation5 + $0x100] sm:$0xff]   ;;  %v921_v52 = vld [vmem:[#allocation5 + $0xf8] sm:$0xff]   ;;  %v922_v53 = vld [vmem:[#allocation5 + $0xf0] sm:$0xff]  }
  0x30   :  { %821 = vmatprep.mubr.msk.bf16.mxu0 %vm1027_vm0, %v1026_v0  ;;  %790 = vmatpush3.bf16.msra.mxu1 %v897_v7  ;;  %v923_v54 = vld [vmem:[#allocation5 + $0xe8] sm:$0xff]   ;;  %v924_v55 = vld [vmem:[#allocation5 + $0xe0] sm:$0xff]   ;;  %v925_v1 = vld [vmem:[#allocation5 + $0xd8] sm:$0xff]  }
  0x31   :  { %791 = vmatprep.subr.bf16.mxu1 %v1026_v0  ;;  %806 = vmatpush3.bf16.msra.mxu0 %v903_v13  ;;  %v926_v2 = vld [vmem:[#allocation5 + $0xd0] sm:$0xff]   ;;  %v927_v3 = vld [vmem:[#allocation5 + $0x148] sm:$0xff]   ;;  %v928_v4 = vld [vmem:[#allocation5 + $0x140] sm:$0xff]  }
  0x32   :  { %807 = vmatprep.subr.bf16.mxu0 %v1026_v0  ;;  %v929_v5 = vld [vmem:[#allocation5 + $0x138] sm:$0xff]   ;;  %v930_v6 = vld [vmem:[#allocation5 + $0x130] sm:$0xff]   ;;  %v931_v7 = vld [vmem:[#allocation5 + $0x128] sm:$0xff]  }
  0x33   :  { %v934_v19 = vld [vmem:[#allocation5 + $0x110] sm:$0xff]  }
  0x34   :  { %792 = vmatpush3.bf16.msra.mxu1 %v898_v8  ;;  %v932_v8 = vld [vmem:[#allocation5 + $0x120] sm:$0xff]  }
  0x35   :  { %793 = vmatprep.subr.bf16.mxu1 %v1026_v0  ;;  %808 = vmatpush3.bf16.msra.mxu0 %v904_v14 }
  0x36   :  { %809 = vmatprep.subr.bf16.mxu0 %v1026_v0 }
  0x38   :  { %794 = vmatpush3.bf16.msra.mxu1 %v899_v9  ;;  %v359_v9 = vsub.s32 3, %v1082_v20 }
  0x39   :  { %795 = vmatprep.subr.bf16.mxu1 %v1026_v0  ;;  %810 = vmatpush3.bf16.msra.mxu0 %v905_v15 }
  0x3a   :  { %811 = vmatprep.subr.bf16.mxu0 %v1026_v0 }
  0x3c   :  { %796 = vmatpush3.bf16.msra.mxu1 %v900_v10  ;;  %v360_v10 = vrot.slane %v1085_v22, %v359_v9 }
  0x3d   :  { %797 = vmatprep.subr.bf16.mxu1 %v1026_v0  ;;  %812 = vmatpush3.bf16.msra.mxu0 %v906_v16 }
  0x3e   :  { %813 = vmatprep.subr.bf16.mxu0 %v1026_v0 }
  0x40   :  { %798 = vmatpush3.bf16.msra.mxu1 %v901_v11 }
  0x41   :  { %799 = vmatprep.subr.bf16.mxu1 %v1026_v0  ;;  %814 = vmatpush3.bf16.msra.mxu0 %v907_v17 }
  0x42   :  { %815 = vmatprep.subr.bf16.mxu0 %v1026_v0 }
  0x44   :  { %800 = vmatpush3.bf16.msra.mxu1 %v902_v12 }
  0x45   :  { %825 = vmatprep.subr.bf16.mxu1 %v1026_v0  ;;  %816 = vmatpush3.bf16.msra.mxu0 %v908_v18  ;;  %v933_v18 = vld [vmem:[#allocation5 + $0x118] sm:$0xff]  }
  0x46   :  { %817 = vmatprep.subr.bf16.mxu0 %v1026_v0 }
  0x49   :  { %818 = vmatpush3.bf16.msra.mxu0 %v909_v31  ;;  %v579_v31 = vsub.s32 5, %v1082_v20 }
  0x4a   :  { %819 = vmatprep.subr.bf16.mxu0 %v1026_v0 }
  0x4d   :  { %820 = vmatpush3.bf16.msra.mxu0 %v910_v32  ;;  %v580_v32 = vrot.slane %v1085_v22, %v579_v31 }
  0x4e   :  { %845 = vmatprep.subr.bf16.mxu0 %v1026_v0 }
  0xef   :  { %v114_v24 = vpop.f32.mrf.mxu0 }
  0xf0   :  { %v115_v25 = vadd.f32 %v114_v24, %v63_v23  ;;  %v470_v23 = vrot.slane %v1085_v22, %v469_v21 }
  0xf1   :  { %v783_v26 = vpop.f32.mrf.mxu0 }
  0xf2   :  { %v120_v27 = vmax.f32 %v115_v25, 0.0 }
  0xf3   :  { %v117_v28 = vpop.f32.mrf.mxu0 }
  0xf4   :  { %v137_v29 = vpack.c.bf16 %v120_v27, %v120_v27 }
  0xf5   :  { %v784_v30 = vpop.f32.mrf.mxu0 }
  0xf6   :  { %802 = vmatmul.mubr.bf16.vlgmr.msra.gmra.mxu1 %v137_v29 }
  0xf7   :  { %841 = vmatprep.mubr.msk.bf16.mxu1 %vm1027_vm0, %v1026_v0  ;;  %826 = vmatpush3.bf16.msra.mxu1 %v911_v33 }
  0xf8   :  { %827 = vmatprep.subr.bf16.mxu1 %v1026_v0 }
  0xfb   :  { %828 = vmatpush3.bf16.msra.mxu1 %v912_v34 }
  0xfc   :  { %829 = vmatprep.subr.bf16.mxu1 %v1026_v0 }
  0xff   :  { %830 = vmatpush3.bf16.msra.mxu1 %v913_v35 }
 0x100   :  { %831 = vmatprep.subr.bf16.mxu1 %v1026_v0 }
 0x103   :  { %832 = vmatpush3.bf16.msra.mxu1 %v914_v36 }
 0x104   :  { %833 = vmatprep.subr.bf16.mxu1 %v1026_v0 }
 0x107   :  { %834 = vmatpush3.bf16.msra.mxu1 %v915_v37 }
 0x108   :  { %835 = vmatprep.subr.bf16.mxu1 %v1026_v0 }
 0x10b   :  { %836 = vmatpush3.bf16.msra.mxu1 %v916_v38 }
 0x10c   :  { %837 = vmatprep.subr.bf16.mxu1 %v1026_v0 }
 0x10f   :  { %838 = vmatpush3.bf16.msra.mxu1 %v917_v39 }
 0x110   :  { %839 = vmatprep.subr.bf16.mxu1 %v1026_v0 }
 0x113   :  { %840 = vmatpush3.bf16.msra.mxu1 %v918_v49 }
 0x114   :  { %865 = vmatprep.subr.bf16.mxu1 %v1026_v0 }
 0x1b6   :  { %v224_v42 = vpop.f32.mrf.mxu1 }
 0x1b7   :  { %v225_v43 = vadd.f32 %v224_v42, %v141_v41 }
 0x1b8   :  { %v803_v44 = vpop.f32.mrf.mxu1 }
 0x1b9   :  { %v230_v45 = vmax.f32 %v225_v43, 0.0 }
 0x1ba   :  { %v227_v46 = vpop.f32.mrf.mxu1 }
 0x1bb   :  { %v247_v47 = vpack.c.bf16 %v230_v45, %v230_v45 }
 0x1bc   :  { %v804_v48 = vpop.f32.mrf.mxu1 }
 0x1bd   :  { %822 = vmatmul.mubr.bf16.vlgmr.msra.gmra.mxu0 %v247_v47 }
 0x1be   :  { %861 = vmatprep.mubr.msk.bf16.mxu0 %vm1027_vm0, %v1026_v0  ;;  %846 = vmatpush3.bf16.msra.mxu0 %v919_v50 }
 0x1bf   :  { %847 = vmatprep.subr.bf16.mxu0 %v1026_v0 }
 0x1c2   :  { %848 = vmatpush3.bf16.msra.mxu0 %v920_v51 }
 0x1c3   :  { %849 = vmatprep.subr.bf16.mxu0 %v1026_v0 }
 0x1c6   :  { %850 = vmatpush3.bf16.msra.mxu0 %v921_v52 }
 0x1c7   :  { %851 = vmatprep.subr.bf16.mxu0 %v1026_v0 }
 0x1ca   :  { %852 = vmatpush3.bf16.msra.mxu0 %v922_v53 }
 0x1cb   :  { %853 = vmatprep.subr.bf16.mxu0 %v1026_v0 }
 0x1ce   :  { %854 = vmatpush3.bf16.msra.mxu0 %v923_v54 }
 0x1cf   :  { %855 = vmatprep.subr.bf16.mxu0 %v1026_v0 }
 0x1d2   :  { %856 = vmatpush3.bf16.msra.mxu0 %v924_v55 }
 0x1d3   :  { %857 = vmatprep.subr.bf16.mxu0 %v1026_v0 }
 0x1d6   :  { %858 = vmatpush3.bf16.msra.mxu0 %v925_v1 }
 0x1d7   :  { %859 = vmatprep.subr.bf16.mxu0 %v1026_v0 }
 0x1da   :  { %860 = vmatpush3.bf16.msra.mxu0 %v926_v2 }
 0x27d   :  { %v334_v58 = vpop.f32.mrf.mxu0 }
 0x27e   :  { %v335_v59 = vadd.f32 %v334_v58, %v251_v57 }
 0x27f   :  { %v823_v60 = vpop.f32.mrf.mxu0 }
 0x280   :  { %v356_v61 = vpack.c.bf16 %v335_v59, %v335_v59 }
 0x281   :  { %v337_v62 = vpop.f32.mrf.mxu0 }
 0x282   :  { %842 = vmatmul.mubr.bf16.vlgmr.msra.gmra.mxu1 %v356_v61 }
 0x283   :  { %v824_v63 = vpop.f32.mrf.mxu0  ;;  %881 = vmatprep.mubr.msk.bf16.mxu1 %vm1027_vm0, %v1026_v0  ;;  %866 = vmatpush3.bf16.msra.mxu1 %v927_v3 }
 0x284   :  { %867 = vmatprep.subr.bf16.mxu1 %v1026_v0 }
 0x287   :  { %868 = vmatpush3.bf16.msra.mxu1 %v928_v4 }
 0x288   :  { %869 = vmatprep.subr.bf16.mxu1 %v1026_v0 }
 0x28b   :  { %870 = vmatpush3.bf16.msra.mxu1 %v929_v5 }
 0x28c   :  { %871 = vmatprep.subr.bf16.mxu1 %v1026_v0 }
 0x28f   :  { %872 = vmatpush3.bf16.msra.mxu1 %v930_v6 }
 0x290   :  { %873 = vmatprep.subr.bf16.mxu1 %v1026_v0 }
 0x293   :  { %874 = vmatpush3.bf16.msra.mxu1 %v931_v7 }
 0x294   :  { %875 = vmatprep.subr.bf16.mxu1 %v1026_v0 }
 0x297   :  { %876 = vmatpush3.bf16.msra.mxu1 %v932_v8 }
 0x298   :  { %877 = vmatprep.subr.bf16.mxu1 %v1026_v0 }
 0x29b   :  { %878 = vmatpush3.bf16.msra.mxu1 %v933_v18 }
 0x29c   :  { %879 = vmatprep.subr.bf16.mxu1 %v1026_v0 }
 0x29f   :  { %880 = vmatpush3.bf16.msra.mxu1 %v934_v19 }
 0x342   :  { %v443_v11 = vpop.f32.mrf.mxu1 }
 0x343   :  { %v444_v12 = vadd.f32 %v443_v11, %v360_v10 }
 0x344   :  { %v843_v13 = vpop.f32.mrf.mxu1 }
 0x345   :  { %v449_v14 = vmax.f32 %v444_v12, 0.0 }
 0x346   :  { %v446_v15 = vpop.f32.mrf.mxu1 }
 0x347   :  { %v466_v16 = vpack.c.bf16 %v449_v14, %v449_v14 }
 0x348   :  { %v844_v17 = vpop.f32.mrf.mxu1 }
 0x349   :  { %862 = vmatmul.mubr.bf16.vlgmr.msra.gmra.mxu0 %v466_v16 }
 0x409   :  { %v553_v24 = vpop.f32.mrf.mxu0 }
 0x40a   :  { %v554_v25 = vadd.f32 %v553_v24, %v470_v23 }
 0x40b   :  { %v863_v26 = vpop.f32.mrf.mxu0 }
 0x40c   :  { %v559_v27 = vmax.f32 %v554_v25, 0.0 }
 0x40d   :  { %v556_v28 = vpop.f32.mrf.mxu0 }
 0x40e   :  { %v576_v29 = vpack.c.bf16 %v559_v27, %v559_v27 }
 0x40f   :  { %v864_v30 = vpop.f32.mrf.mxu0 }
 0x410   :  { %882 = vmatmul.mubr.bf16.vlgmr.msra.gmra.mxu1 %v576_v29 }
 0x4d0   :  { %v663_v0 = vpop.f32.mrf.mxu1 }
 0x4d1   :  { %v664_v33 = vadd.f32 %v663_v0, %v580_v32 }
 0x4d2   :  { %v883_v34 = vpop.f32.mrf.mxu1 }
 0x4d3   :  { %669 = vst [vmem:[#allocation8] sm:$0xff] %v664_v33 }
 0x4d4   :  { %v666_v35 = vpop.f32.mrf.mxu1 }
 0x4d5   :  { %1006 = shalt.err (!%p1003_p5)
}
 0x4d6   :  { %679 = dma.vmem_to_hbm [thread:$0]  %s677_s2, 128, %s1134_s3, [#allocation4]   ;;  %v884_v20 = vpop.f32.mrf.mxu1 }
 0x4d7   :  { %1019 = dma.done.wait [#allocation4], 128  }
 0x4d8   :  { %1020 = vsyncadd [#allocation4], 4294967168 }
 0x4d9   :  { %683 = vsyncpa [#allocation3], 1 }
 0x4da   :  { %684 = vsyncpa [#allocation6], 1 }
 0x4db   :  { %685 = vsyncpa [#allocation4], 1 }

</bundles_post_ra>
